<compile_context>
chip_gen: v5e
topology: v5e:2x2
jax: 0.10.0
libtpu: 0.0.40
codegen_flags: <defaults>
</compile_context>

<pallas_src>
import numpy as np
import jax
import jax.numpy as jnp
from jax.experimental import pallas as pl
from jax.experimental.pallas import tpu as pltpu


# ------------------------- weight-matrix construction (plain numpy) ------------------

def _cubic_conv1(x, a):
    # |x| <= 1 branch of the cubic convolution kernel (PyTorch upsample_bicubic2d)
    return ((a + 2.0) * x - (a + 3.0)) * x * x + 1.0


def _cubic_conv2(x, a):
    # 1 < |x| < 2 branch
    return ((a * x - 5.0 * a) * x + 8.0 * a) * x - 4.0 * a


def _bicubic_matrix(in_size, out_size, a=-0.75):
    """Matrix replicating F.interpolate(mode='bicubic', align_corners=False) on one axis."""
    W = np.zeros((out_size, in_size), dtype=np.float32)
    if in_size == out_size:
        np.fill_diagonal(W, 1.0)  # PyTorch short-circuits to a copy
        return W
    scale = in_size / out_size
    for i in range(out_size):
        real = scale * (i + 0.5) - 0.5          # half-pixel mapping (no clamp for cubic)
        i0 = int(np.floor(real))
        t = real - i0
        coeffs = [
            _cubic_conv2(t + 1.0, a),
            _cubic_conv1(t, a),
            _cubic_conv1(1.0 - t, a),
            _cubic_conv2(2.0 - t, a),
        ]
        for k in range(4):
            idx = min(max(i0 - 1 + k, 0), in_size - 1)   # border-replicate taps
            W[i, idx] += coeffs[k]
    return W


def _adaptive_avg_matrix(in_size, out_size):
    """Matrix replicating F.adaptive_avg_pool2d along one axis (mode='avg')."""
    W = np.zeros((out_size, in_size), dtype=np.float32)
    for i in range(out_size):
        start = (i * in_size) // out_size
        end = -(-((i + 1) * in_size) // out_size)  # ceil
        W[i, start:end] = 1.0 / (end - start)
    return W


# --------------------------------- Pallas kernel -------------------------------------

def _resize_kernel(wh_ref, wwt_ref, x_ref, o_ref, r_ref):
    # wh_ref  : (H_out, H_in)
    # wwt_ref : (W_in, W_out)
    # x_ref   : (Bc, H_in, W_in)         -- Bc channels of this grid step
    # o_ref   : (1, H_out, Bc*W_out)     -- lane-dense output block
    # r_ref   : (H_in, Bc*W_out) scratch -- channel batch packed into the lane dim
    Bc, H_in, W_in = x_ref.shape
    W_out = wwt_ref.shape[1]

    # W-side matmul folded across the channel batch (M = Bc*H_in fills the MXU).
    t = jnp.dot(x_ref[...].reshape(Bc * H_in, W_in), wwt_ref[...],
                preferred_element_type=jnp.float32)            # (Bc*H_in, W_out) f32

    # Relayout (Bc, H_in, W_out) -> (H_in, Bc*W_out): channels go into the lane dim
    # so the H-side contraction is one lane-dense MXU matmul and the output store
    # is full-width.  Bc is small; the loop unrolls to a few VMEM slice writes.
    for b in range(Bc):
        r_ref[:, b * W_out:(b + 1) * W_out] = (
            t[b * H_in:(b + 1) * H_in, :].astype(r_ref.dtype))

    # H-side matmul, N = Bc*W_out (lane-dense), f32 accumulate, write final dtype.
    o_ref[0] = jnp.dot(wh_ref[...], r_ref[...],
                       preferred_element_type=jnp.float32).astype(o_ref.dtype)


# --------------------------------- wrapper -------------------------------------------

def _pick_channels_per_step(B, H_in, W_in, H_out, W_out, x_itemsize, r_itemsize,
                            vmem_budget=16 * 1024 * 1024):
    """Largest divisor of B (<= 32) whose per-step blocks fit the VMEM budget, while
    keeping >= 2 grid steps so both v7x TensorCores get work (no-op on v5e/v6e)."""
    best = 1
    for d in range(1, min(B, 32) + 1):
        if B % d:
            continue
        if B > 1 and B // d < 2:
            continue
        step_bytes = (
            2 * d * H_in * W_in * x_itemsize        # double-buffered input block
            + 2 * H_out * d * W_out * x_itemsize    # double-buffered output block
            + d * H_in * W_out * 4                  # f32 intermediate of matmul #1
            + d * H_in * W_out * r_itemsize         # relayout scratch
        )
        if step_bytes <= vmem_budget:
            best = d
    return best


def resolution_resize(x, target_height, target_width, mode="interp"):
    """Pallas equivalent of ResolutionResizer(height, width, mode).forward(x) (NCHW)."""
    N, C, H_in, W_in = x.shape
    H_out, W_out = int(target_height), int(target_width)

    if mode == "interp":
        Wh = _bicubic_matrix(H_in, H_out)
        Ww = _bicubic_matrix(W_in, W_out)
    elif mode == "avg":
        Wh = _adaptive_avg_matrix(H_in, H_out)
        Ww = _adaptive_avg_matrix(W_in, W_out)
    else:
        raise ValueError(f"unsupported mode: {mode}")

    # Keep HBM traffic in the input dtype; bf16 inputs get bf16 MXU operands with
    # f32 accumulation, everything else computes in f32 (same numerics as before).
    w_dtype = jnp.bfloat16 if x.dtype == jnp.dtype(jnp.bfloat16) else jnp.float32
    wh = jnp.asarray(Wh, dtype=w_dtype)
    wwt = jnp.asarray(Ww.T, dtype=w_dtype)

    B = N * C
    Bc = _pick_channels_per_step(B, H_in, W_in, H_out, W_out,
                                 x.dtype.itemsize, wh.dtype.itemsize)
    G = B // Bc
    xf = x.reshape(B, H_in, W_in)   # no dtype cast: HBM read stays in native dtype

    flops = 2 * B * H_in * W_out * (W_in + H_out)
    bytes_accessed = (B * H_in * W_in * x.dtype.itemsize
                      + B * H_out * W_out * x.dtype.itemsize
                      + (wh.size + wwt.size) * wh.dtype.itemsize)

    out = pl.pallas_call(
        _resize_kernel,
        out_shape=jax.ShapeDtypeStruct((G, H_out, Bc * W_out), x.dtype),
        grid_spec=pltpu.PrefetchScalarGridSpec(
            num_scalar_prefetch=0,
            grid=(G,),
            in_specs=[
                # weight blocks: constant block index -> DMA'd once, reused each step
                pl.BlockSpec((H_out, H_in), lambda g: (0, 0)),
                pl.BlockSpec((W_in, W_out), lambda g: (0, 0)),
                # Bc channels per step
                pl.BlockSpec((Bc, H_in, W_in), lambda g: (g, 0, 0)),
            ],
            out_specs=pl.BlockSpec((1, H_out, Bc * W_out), lambda g: (g, 0, 0)),
            scratch_shapes=[pltpu.VMEM((H_in, Bc * W_out), w_dtype)],
        ),
        compiler_params=pltpu.CompilerParams(
            dimension_semantics=("parallel",),
            vmem_limit_bytes=64 * 1024 * 1024,
        ),
        cost_estimate=pl.CostEstimate(flops=int(flops), transcendentals=0,
                                      bytes_accessed=int(bytes_accessed)),
    )(wh, wwt, xf)

    # Unpack channels from the lane dimension (cheap XLA layout plumbing on the
    # small output tensor), back to NCHW.
    out = (out.reshape(G, H_out, Bc, W_out)
              .transpose(0, 2, 1, 3)
              .reshape(N, C, H_out, W_out))
    return out


# ------------------------------------- demo ------------------------------------------

if __name__ == "__main__":
    key = jax.random.PRNGKey(0)
    # small NCHW input, consistent with an image-resize module
    x = jax.random.normal(key, (2, 4, 16, 16), dtype=jnp.float32)

    target_h, target_w = 8, 8

    # bicubic path (default mode of the PyTorch module)
    y = resolution_resize(x, target_h, target_w, mode="interp")
    y = jax.block_until_ready(y)
    assert y.shape == (2, 4, target_h, target_w), y.shape
    assert y.dtype == x.dtype

    # identity resize should reproduce the input exactly (PyTorch copies)
    y_id = jax.block_until_ready(resolution_resize(x, 16, 16, mode="interp"))
    assert jnp.allclose(y_id, x, atol=1e-6)

    # adaptive_avg_pool2d path; 16 -> 8 divides evenly so it equals a 2x2 mean pool
    y_avg = jax.block_until_ready(resolution_resize(x, target_h, target_w, mode="avg"))
    assert y_avg.shape == (2, 4, target_h, target_w)
    ref_avg = x.reshape(2, 4, 8, 2, 8, 2).mean(axis=(3, 5))
    assert jnp.allclose(y_avg, ref_avg, atol=1e-5)

    print("KERNEL_OK")
</pallas_src>

<mosaic_0001>
module attributes {stable_mosaic.version = 11 : i64} {
  func.func @_resize_kernel(%arg0: i32, %arg1: memref<8x16xf32, #tpu.memory_space<vmem>>, %arg2: memref<16x8xf32, #tpu.memory_space<vmem>>, %arg3: memref<4x16x16xf32, #tpu.memory_space<vmem>>, %arg4: memref<1x8x32xf32, #tpu.memory_space<vmem>>, %arg5: memref<16x32xf32, #tpu.memory_space<vmem>>) attributes {dimension_semantics = [#tpu.dimension_semantics<parallel>], iteration_bounds = array<i64: 2>, scalar_prefetch = 0 : i64, scratch_operands = 1 : i64, tpu.core_type = #tpu.core_type<tc>, window_params = [{pipeline_mode = #tpu.pipeline_mode<synchronous>, transform_indices = @transform_0, window_bounds = array<i64: 8, 16>}, {pipeline_mode = #tpu.pipeline_mode<synchronous>, transform_indices = @transform_1, window_bounds = array<i64: 16, 8>}, {transform_indices = @transform_2, window_bounds = array<i64: 4, 16, 16>}, {transform_indices = @transform_3, window_bounds = array<i64: 1, 8, 32>}]} {
    %c0 = arith.constant 0 : index
    %c0_0 = arith.constant 0 : index
    %c0_1 = arith.constant 0 : index
    %0 = vector.load %arg3[%c0, %c0_0, %c0_1] : memref<4x16x16xf32, #tpu.memory_space<vmem>>, vector<4x16x16xf32>
    %1 = vector.shape_cast %0 : vector<4x16x16xf32> to vector<64x16xf32>
    %c0_2 = arith.constant 0 : index
    %c0_3 = arith.constant 0 : index
    %2 = vector.load %arg2[%c0_2, %c0_3] : memref<16x8xf32, #tpu.memory_space<vmem>>, vector<16x8xf32>
    %cst = arith.constant dense<0.000000e+00> : vector<64x8xf32>
    %3 = tpu.matmul %1, %2, %cst {dimension_numbers = #tpu.dot_dimension_numbers<[1], [0], [0], [1], [0, 0, 1, 1], [], []>} : vector<64x16xf32>, vector<16x8xf32>, vector<64x8xf32> -> vector<64x8xf32>
    %4 = vector.extract_strided_slice %3 {offsets = [0, 0], sizes = [16, 8], strides = [1, 1]} : vector<64x8xf32> to vector<16x8xf32>
    %c0_4 = arith.constant 0 : index
    %c0_5 = arith.constant 0 : index
    %5 = vector.load %arg5[%c0_4, %c0_5] : memref<16x32xf32, #tpu.memory_space<vmem>>, vector<16x8xf32>
    tpu.vector_store %arg5[%c0_4, %c0_5], %4 {strides = array<i32>} : memref<16x32xf32, #tpu.memory_space<vmem>>, vector<16x8xf32>,
    %6 = vector.extract_strided_slice %3 {offsets = [16, 0], sizes = [16, 8], strides = [1, 1]} : vector<64x8xf32> to vector<16x8xf32>
    %c0_6 = arith.constant 0 : index
    %c8 = arith.constant 8 : index
    %7 = vector.load %arg5[%c0_6, %c8] : memref<16x32xf32, #tpu.memory_space<vmem>>, vector<16x8xf32>
    tpu.vector_store %arg5[%c0_6, %c8], %6 {strides = array<i32>} : memref<16x32xf32, #tpu.memory_space<vmem>>, vector<16x8xf32>,
    %8 = vector.extract_strided_slice %3 {offsets = [32, 0], sizes = [16, 8], strides = [1, 1]} : vector<64x8xf32> to vector<16x8xf32>
    %c0_7 = arith.constant 0 : index
    %c16 = arith.constant 16 : index
    %9 = vector.load %arg5[%c0_7, %c16] : memref<16x32xf32, #tpu.memory_space<vmem>>, vector<16x8xf32>
    tpu.vector_store %arg5[%c0_7, %c16], %8 {strides = array<i32>} : memref<16x32xf32, #tpu.memory_space<vmem>>, vector<16x8xf32>,
    %10 = vector.extract_strided_slice %3 {offsets = [48, 0], sizes = [16, 8], strides = [1, 1]} : vector<64x8xf32> to vector<16x8xf32>
    %c0_8 = arith.constant 0 : index
    %c24 = arith.constant 24 : index
    %11 = vector.load %arg5[%c0_8, %c24] : memref<16x32xf32, #tpu.memory_space<vmem>>, vector<16x8xf32>
    tpu.vector_store %arg5[%c0_8, %c24], %10 {strides = array<i32>} : memref<16x32xf32, #tpu.memory_space<vmem>>, vector<16x8xf32>,
    %c0_9 = arith.constant 0 : index
    %c0_10 = arith.constant 0 : index
    %12 = vector.load %arg1[%c0_9, %c0_10] : memref<8x16xf32, #tpu.memory_space<vmem>>, vector<8x16xf32>
    %c0_11 = arith.constant 0 : index
    %c0_12 = arith.constant 0 : index
    %13 = vector.load %arg5[%c0_11, %c0_12] : memref<16x32xf32, #tpu.memory_space<vmem>>, vector<16x32xf32>
    %cst_13 = arith.constant dense<0.000000e+00> : vector<8x32xf32>
    %14 = tpu.matmul %12, %13, %cst_13 {dimension_numbers = #tpu.dot_dimension_numbers<[1], [0], [0], [1], [0, 0, 1, 1], [], []>} : vector<8x16xf32>, vector<16x32xf32>, vector<8x32xf32> -> vector<8x32xf32>
    %c0_14 = arith.constant 0 : index
    %c0_15 = arith.constant 0 : index
    %c0_16 = arith.constant 0 : index
    %15 = vector.load %arg4[%c0_14, %c0_15, %c0_16] : memref<1x8x32xf32, #tpu.memory_space<vmem>>, vector<1x8x32xf32>
    %16 = vector.shape_cast %15 : vector<1x8x32xf32> to vector<8x32xf32>
    %17 = vector.shape_cast %14 : vector<8x32xf32> to vector<1x8x32xf32>
    tpu.vector_store %arg4[%c0_14, %c0_15, %c0_16], %17 {strides = array<i32>} : memref<1x8x32xf32, #tpu.memory_space<vmem>>, vector<1x8x32xf32>,
    return
  }
  func.func @transform_0(%arg0: i32) -> (i32, i32) {
    %c0_i32 = arith.constant 0 : i32
    %c0_i32_0 = arith.constant 0 : i32
    %c0_i32_1 = arith.constant 0 : i32
    return %c0_i32, %c0_i32_0 : i32, i32
  }
  func.func @transform_1(%arg0: i32) -> (i32, i32) {
    %c0_i32 = arith.constant 0 : i32
    %c0_i32_0 = arith.constant 0 : i32
    %c0_i32_1 = arith.constant 0 : i32
    return %c0_i32, %c0_i32_0 : i32, i32
  }
  func.func @transform_2(%arg0: i32) -> (i32, i32, i32) {
    %c0_i32 = arith.constant 0 : i32
    %c0_i32_0 = arith.constant 0 : i32
    %c0_i32_1 = arith.constant 0 : i32
    return %arg0, %c0_i32, %c0_i32_0 : i32, i32, i32
  }
  func.func @transform_3(%arg0: i32) -> (i32, i32, i32) {
    %c0_i32 = arith.constant 0 : i32
    %c0_i32_0 = arith.constant 0 : i32
    %c0_i32_1 = arith.constant 0 : i32
    return %arg0, %c0_i32, %c0_i32_0 : i32, i32, i32
  }
}

</mosaic_0001>

<bundles_post_ra>
// kernel: tpu_custom_call.1
= control target key start
LH: loop header
LB: loop body
LE: loop exit
PB: predicated region body
PF: predicated region fallthrough
CT: control target
= control target key end

     0   :  { %8 = vsyncpa [#allocation4], 0  ;;  %s768_s0 = inlined_call_operand.vmem [shape: f32[8,16], index: 0, kind: input, shape index: {}]   ;;  %s769_s1 = inlined_call_operand.vmem [shape: f32[16,8], index: 1, kind: input, shape index: {}]   ;;  %s770_s2 = inlined_call_operand.hbm [shape: f32[8,16,16], index: 2, kind: input, shape index: {}]   ;;  %s771_s3 = inlined_call_operand.hbm [shape: f32[2,8,32], index: 3, kind: output, shape index: {}]  }
   0x1   :  { %10 = vsyncpa [#allocation4 + $0x1], 0 }
   0x2   :  { %11 = vsyncpa [#allocation5], 0 }
   0x3   :  { %13 = vsyncpa [#allocation5 + $0x1], 0  ;;  %s622_s12 = smov 0   ;;  %s624_s13 = smov 0  }
   0x4   :  { %s626_s14 = smov 0   ;;  %s628_s15 = smov 0  }
   0x5 LB: > { %s643_s16 = sadd.s32 4294967295, %s595_s15   ;;  %s419_s17 = sadd.s32 4294967294, %s595_s15   ;;  %s595_s15 = sphi %s628_s15, %s781_s15   ;;  %s591_s14 = sphi %s626_s14, %s780_s14   ;;  %s587_s13 = sphi %s624_s13, %s779_s13   ;;  %s583_s12 = sphi %s622_s12, %s778_s12  }
   0x6   : > { %s647_s18 = sadd.s32 1, %s595_s15   ;;  %s68_s19 = sadd.s32 1, %s591_s14 }
   0x7   : > { %s65_s20 = ssub.s32 %s595_s15, %s647_s18  ;;  %p75_p0 = scmp.ne.s32.totalorder %s591_s14, %s587_s13 }
   0x8   : > { %p66_p1 = scmp.eq.s32.totalorder %s65_s20, 0  ;;  %p76_p2 = scmp.eq.s32.totalorder %s595_s15, 0 }
   0x9   : > { %p81_p3 = scmp.ne.s32.totalorder %s587_s13, %s583_s12  ;;  %p82_p4 = scmp.eq.s32.totalorder %s643_s16, 0 }
   0xa   : > { %s659_s21 = scalar_select %p66_p1, %s591_s14, %s68_s19  }
   0xb   : > { %p661_p5 = por %p76_p2, %p75_p0  ;;  %p665_p6 = por %p82_p4, %p81_p3 }
   0xc   : > { %p105_p7 = scmp.eq.s32.totalorder %s643_s16, 1  ;;  %p111_p8 = scmp.eq.s32.totalorder %s419_s17, 1 }
   0xd   : > { %p460_p10 = scmp.lt.s32.totalorder %s595_s15, 2  ;;  %s137_s26 = sand.u32 1, %s591_s14  }
   0xe   : > { %p672_p11 = por %p105_p7, %p75_p0  ;;  %p676_p12 = por %p111_p8, %p81_p3 }
   0xf   : > { %s443_s27 = sshll.u32 %s595_s15, 6  ;;  %s422_s28 = sshll.u32 %s137_s26, 6 }
  0x10   : > { %s147_s4 = scalar_lea.hbm %s770_s2, %s443_s27  ;;  %s141_s6 = scalar_lea.vmem [#allocation3], %s422_s28 }
  0x11   : > { %s148_s5 = sshll.u32 %s147_s4, 4  ;;  %s150_s7 = sshll.u32 %s141_s6, 4  ;;  %s149_s5 = int_to_ptr.hbm [resolvable:$true] %s148_s5  ;;  %s151_s7 = int_to_ptr.vmem [resolvable:$true] %s150_s7 }
  0x12   : > { %p687_p13 = pnand %p460_p10, %p661_p5  ;;  %p426_p0 = scmp.ge.s32.totalorder %s595_s15, 1 }
  0x13   : > { %p158_p1 = scmp.lt.s32.totalorder %s595_s15, 3  ;;  %s138_s9 = scalar_lea.sflag [#allocation4], %s137_s26 }
  0x14   : > { %s499_s10 = sshra.s32 %s149_s5, 4  ;;  %p503_p3 = pneg %p687_p13  ;;  %s500_s10 = int_to_ptr.hbm [resolvable:$true] %s499_s10 }
  0x15   : > { %s501_s11 = scalar_lea.hbm %s500_s10, 64  ;;  %s506_s20 = scalar_lea.hbm %s770_s2, 128 }
  0x16   : > { %p502_p2 = scmp.ne.s32.totalorder %s500_s10, %s501_s11  ;;  %p507_p5 = scmp.lt.s32.totalorder %s500_s10, %s770_s2 }
  0x17   : > { %p508_p8 = scmp.lt.s32.totalorder %s506_s20, %s501_s11 }
  0x18   : > { %p504_p4 = pnand %p503_p3, %p502_p2 }
  0x19   : > { %p509_p10 = por %p508_p8, %p507_p5 }
  0x1a   : > { %p505_p7 = pneg %p504_p4 }
  0x1c   : > { %p510_p9 = pnand %p509_p10, %p505_p7 }
  0x1e   : > { %513 = shalt.err (!%p510_p9)
}
  0x1f   : > { %s597_s26 = smov 128   ;;  %s598_s28 = smov 8  }
  0x20   : > { %455 = dma.hbm_to_vmem [thread:$0]  (!%p687_p13), %s149_s5, 1024, %s151_s7, %s138_s9, %s597_s26, %s597_s26, %s598_s28  }
  0x21   : > { %p159_p2 = pnand %p426_p0, %p158_p1 }
  0x22   : > { %s708_s29 = sand.u32 (!%p159_p2), 1, %s587_s13  }
  0x23   : > { %162 = sbr.rel (%p159_p2) target bundleno = 450 (0x1c2), region = 32  ;;  %s427_s30 = sshll.u32 (!%p159_p2), %s708_s29, 6 }
  0x24   : > { %s165_s4 = scalar_lea.sflag (!%p159_p2), [#allocation4], %s708_s29  ;;  %s168_s6 = scalar_lea.vmem (!%p159_p2), [#allocation3], %s427_s30 }
  0x28   : > { %574 = dma.done.wait (%p665_p6), %s165_s4, 1024  }
  0x29   : > { %576 = vsyncadd (%p665_p6), %s165_s4, 4294966272  ;;  %v202_v0 = vld [vmem:[%s769_s1 + $0x8] sm:$0xff]  ;;  %v201_v1 = vld [vmem:[%s769_s1] sm:$0xff]  ;;  %vm203_vm0 = vcmask 130048   ;;  %vm269_vm1 = vcmask 64512   ;;  %s599_s23 = smov 8  }
  0x2a   : > { %242 = vmatpush.msra.mxu0 %v202_v0  ;;  %444 = vmatpush.msra.mxu2 %v202_v0  ;;  %v193_v2 = vld [vmem:[%s168_s6] sm:$0xff]  ;;  %v196_v3 = vld [vmem:[%s168_s6 + $0x18] sm:$0xff]  ;;  %v199_v4 = vld [vmem:[%s168_s6 + $0x30] sm:$0xff]  ;;  %s600_s10 = smov 16   ;;  %s601_s11 = smov 24   ;;  %vm280_vm2 = vcmask 130112  }
  0x2b   : > { %445 = vmatpush.msra.mxu3 %v202_v0  ;;  %v194_v5 = vld [vmem:[%s168_s6 + $0x8] sm:$0xff]  ;;  %v197_v6 = vld [vmem:[%s168_s6 + $0x20] sm:$0xff]  ;;  %v200_v7 = vld [vmem:[%s168_s6 + $0x38] sm:$0xff]  ;;  %vm291_vm3 = vcmask 195712   ;;  %vm302_vm4 = vcmask 261312   ;;  %s428_s20 = sshll.u32 %s708_s29, 3 }
  0x2c   : > { %243 = vmatpush.msra.mxu0 %v201_v1  ;;  %446 = vmatpush.msra.mxu2 %v201_v1  ;;  %v195_v8 = vld [vmem:[%s168_s6 + $0x10] sm:$0xff]  ;;  %v198_v9 = vld [vmem:[%s168_s6 + $0x28] sm:$0xff]  ;;  %s439_s22 = sshll.u32 %s643_s16, 3  ;;  %s191_s30 = scalar_lea.vmem [#allocation6], %s428_s20  ;;  %vm331_vm5 = vcmask 261120  }
  0x2d   : > { %429 = vmatmul.msk.f32.vlgmr.msra.gmra.mxu0 %vm203_vm0, %v193_v2  ;;  %432 = vmatmul.msk.f32.vlgmr.msra.gmra.mxu2 %vm203_vm0, %v196_v3  ;;  %v305_v25 = vld [vmem:[%s768_s0] sm:$0xff]  ;;  %s344_s28 = scalar_lea.hbm %s771_s3, %s439_s22  ;;  %s346_s4 = sshll.u32 %s191_s30, 4  ;;  %s347_s4 = int_to_ptr.vmem [resolvable:$true] %s346_s4 }
  0x2e   : > { %447 = vmatpush.msra.mxu3 %v201_v1  ;;  %s348_s6 = sshll.u32 %s344_s28, 4  ;;  %s334_s8 = scalar_lea.sflag [#allocation5], %s708_s29  ;;  %s349_s6 = int_to_ptr.hbm [resolvable:$true] %s348_s6 }
  0x2f   : > { %435 = vmatmul.msk.f32.vlgmr.msra.gmra.mxu3 %vm203_vm0, %v199_v4  ;;  %s543_s5 = sshra.s32 %s349_s6, 4  ;;  %s544_s5 = int_to_ptr.hbm [resolvable:$true] %s543_s5 }
  0x30   : > { %s545_s7 = scalar_lea.hbm %s544_s5, 8  ;;  %p550_p0 = scmp.lt.s32.totalorder %s544_s5, %s771_s3 }
  0x31   : > { %p546_p6 = scmp.ne.s32.totalorder %s544_s5, %s545_s7 }
  0x33   : > { %p547_p9 = pnand %p546_p6, %p672_p11 }
  0x35   : > { %430 = vmatmul.msk.f32.gmra.mxu0 %vm203_vm0, %v194_v5  ;;  %433 = vmatmul.msk.f32.gmra.mxu2 %vm203_vm0, %v197_v6  ;;  %p548_p13 = pneg %p547_p9 }
  0x37   : > { %436 = vmatmul.msk.f32.gmra.mxu3 %vm203_vm0, %v200_v7 }
  0x3d   : > { %431 = vmatmul.msk.f32.gmra.mxu0 %vm203_vm0, %v195_v8  ;;  %434 = vmatmul.msk.f32.gmra.mxu2 %vm203_vm0, %v198_v9 }
  0xaa   : > { %v245_v10 = vpop.f32.mrf.mxu0 }
  0xab   : > { %270 = vst.msk [vmem:[#allocation2] sm:$0xff] %vm269_vm1, %v245_v10 }
  0xb0   : > { %v254_v11 = vpop.f32.mrf.mxu2 }
  0xb1   : > { %276 = vrot.lane.b32.xlu0 %v254_v11, %s599_s23 }
  0xb2   : > { %v248_v12 = vpop.f32.mrf.mxu0  ;;  %v263_v13 = vpop.f32.mrf.mxu3 }
  0xb3   : > { %271 = vst.msk [vmem:[#allocation2 + $0x8] sm:$0xff] %vm269_vm1, %v248_v12 }
  0xb8   : > { %v257_v14 = vpop.f32.mrf.mxu2 }
  0xb9   : > { %285 = vrot.lane.b32.xlu2 %v257_v14, %s600_s10 }
  0xba   : > { %v251_v15 = vpop.f32.mrf.mxu0  ;;  %v266_v17 = vpop.f32.mrf.mxu3 }
  0xbb   : > { %274 = vrot.lane.b32.xlu1 %v251_v15, %s599_s23  ;;  %s549_s23 = scalar_lea.hbm %s771_s3, 16 }
  0xbc   : > { %p551_p1 = scmp.lt.s32.totalorder %s549_s23, %s545_s7 }
  0xbe   : > { %p552_p3 = por %p551_p1, %p550_p0 }
  0xc0   : > { %v260_v16 = vpop.f32.mrf.mxu2  ;;  %p553_p4 = pnand %p552_p3, %p548_p13 }
  0xc1   : > { %296 = vrot.lane.b32.xlu2 %v263_v13, %s601_s11  ;;  %287 = vrot.lane.b32.xlu0 %v260_v16, %s600_s10 }
  0xc3   : > { %298 = vrot.lane.b32.xlu1 %v266_v17, %s601_s11 }
 0x113   : > { %v286_v19 = vpop.permute.xlu2 %285 }
 0x11b   : > { %v297_v21 = vpop.permute.xlu2 %296 }
 0x123   : > { %v277_v18 = vpop.permute.xlu0 %276 }
 0x124   : > { %282 = vst.msk [vmem:[#allocation2 + $0x8] sm:$0xff] %vm280_vm2, %v277_v18 }
 0x12d   : > { %v275_v20 = vpop.permute.xlu1 %274 }
 0x12e   : > { %281 = vst.msk [vmem:[#allocation2] sm:$0xff] %vm280_vm2, %v275_v20 }
 0x12f   : > { %292 = vst.msk [vmem:[#allocation2] sm:$0xff] %vm291_vm3, %v286_v19 }
 0x130   : > { %303 = vst.msk [vmem:[#allocation2] sm:$0xff] %vm302_vm4, %v297_v21 }
 0x133   : > { %v288_v22 = vpop.permute.xlu0 %287 }
 0x134   : > { %293 = vst.msk [vmem:[#allocation2 + $0x8] sm:$0xff] %vm291_vm3, %v288_v22 }
 0x135   : > { %v299_v23 = vpop.permute.xlu1 %298 }
 0x136   : > { %304 = vst.msk [vmem:[#allocation2 + $0x8] sm:$0xff] %vm302_vm4, %v299_v23 }
 0x137   : > { %v306_v26 = vld [vmem:[#allocation2] sm:$0xff] }
 0x13d   : > { %v307_v24 = vld [vmem:[#allocation2 + $0x8] sm:$0xff] }
 0x13e   : > { %325 = vmatpush.msra.mxu1 %v307_v24 }
 0x140   : > { %326 = vmatpush.msra.mxu1 %v306_v26 }
 0x141   : > { %437 = vmatmul.msk.f32.vlgmr.msra.gmra.mxu1 %vm203_vm0, %v305_v25 }
 0x1be   : > { %v328_v27 = vpop.f32.mrf.mxu1 }
 0x1bf   : > { %332 = vst.msk [vmem:[%s191_s30] sm:$0xff] %vm331_vm5, %v328_v27 }
 0x1c0   : > { %556 = shalt.err (!%p553_p4)
}
 0x1c1   : > { %450 = dma.vmem_to_hbm [thread:$0]  (%p672_p11), %s347_s4, 128, %s349_s6, %s334_s8  }
 0x1c2 PF: > { %s360_s29 = sand.u32 1, %s583_s12   ;;  %p777_p7 = scmp.ge.s32.totalorder %s595_s15, 2 }
 0x1c3   : > { %s361_s17 = scalar_lea.sflag [#allocation5], %s360_s29 }
 0x1c4   : > { %p457_p5 = pnand %p777_p7, %p676_p12 }
 0x1c6   : > { %p458_p8 = pneg %p457_p5 }
 0x1c8   : > { %578 = dma.done.wait (%p458_p8), %s361_s17, 128  }
 0x1c9   : > { %580 = vsyncadd (%p458_p8), %s361_s17, 4294967168  ;;  %p16_p10 = scmp.ge.s32.totalorder %s647_s18, 4   ;;  %s778_s12 = smov %s587_s13 }
 0x1ca   : > { %s779_s13 = smov %s591_s14  ;;  %s780_s14 = smov %s659_s21 }
 0x1cb   : > { %s781_s15 = smov %s647_s18  ;;  %18 = sbr.rel (!%p16_p10) target bundleno = 5 (0x5), region = 77 }
 0x1d0   :  { %367 = vsyncpa [#allocation4], 1 }
 0x1d1   :  { %369 = vsyncpa [#allocation4 + $0x1], 1 }
 0x1d2   :  { %370 = vsyncpa [#allocation5], 1 }
 0x1d3   :  { %372 = vsyncpa [#allocation5 + $0x1], 1 }

</bundles_post_ra>
